<compile_context>
chip_gen: v7x
topology: tpu7x:2x2x1
jax: 0.10.0
libtpu: 0.0.40
codegen_flags: <defaults>
</compile_context>

<pallas_src>
import jax
import jax.numpy as jnp
from jax.experimental import pallas as pl
from jax.experimental.pallas import tpu as pltpu


def gru_decoder_kernel(tok_ref, h_ref, wx_ref, wh_ref, bg_ref,
                       wout_ref, bout_ref, logits_ref, hnext_ref):
    """One fused GRU decoding step + readout; all tiles resident in VMEM."""
    B, H = h_ref.shape
    V = wx_ref.shape[0]

    tok = tok_ref[...]                                            # (B, 1) int32
    # In-kernel "embedding lookup": one-hot selection fed to the MXU.
    col = jax.lax.broadcasted_iota(jnp.int32, (B, V), 1)
    onehot = jnp.where(col == tok, 1.0, 0.0)                      # (B, V) f32

    h = h_ref[...]                                                # (B, H)

    # Single fused gate pre-activation: (B, 4H) = [r | z | gi_n | gh_n]
    g = (jnp.dot(onehot, wx_ref[...], preferred_element_type=jnp.float32)
         + jnp.dot(h, wh_ref[...], preferred_element_type=jnp.float32)
         + bg_ref[...])

    r = jax.nn.sigmoid(g[:, 0 * H:1 * H])
    z = jax.nn.sigmoid(g[:, 1 * H:2 * H])
    n = jnp.tanh(g[:, 2 * H:3 * H] + r * g[:, 3 * H:4 * H])
    h_new = (1.0 - z) * n + z * h                                 # (B, H)

    hnext_ref[...] = h_new
    # Lane-dense (padded-V) readout.
    logits_ref[...] = (
        jnp.dot(h_new, wout_ref[...], preferred_element_type=jnp.float32)
        + bout_ref[...]
    )


def decoder_step(params, input_token, hidden_state):
    """Mirrors Decoder.forward: returns (logits (B, V), next_hidden (1, B, H))."""
    B = input_token.shape[0]
    H = hidden_state.shape[-1]
    V = params["wx"].shape[0]
    Vpad = params["wout_pad"].shape[-1]

    tok2d = input_token.astype(jnp.int32).reshape(B, 1)
    h_prev = hidden_state[0]                                      # (B, H)

    vmem = pl.BlockSpec(memory_space=pltpu.MemorySpace.VMEM)
    logits_pad, h_next = pl.pallas_call(
        gru_decoder_kernel,
        out_shape=(
            jax.ShapeDtypeStruct((B, Vpad), jnp.float32),
            jax.ShapeDtypeStruct((B, H), jnp.float32),
        ),
        in_specs=[vmem] * 7,
        out_specs=(vmem, vmem),
        # h_prev (input 1) aliases h_next (output 1): no fresh HBM buffer.
        input_output_aliases={1: 1},
    )(tok2d, h_prev,
      params["wx"], params["wh"], params["bgate"],
      params["wout_pad"], params["bout_pad"])

    return logits_pad[:, :V], h_next[None, :, :]


def init_params(key, vocab, embed, hidden):
    """Deterministic synthetic parameters matching PyTorch GRU shapes,
    plus the fused / folded weights the kernel consumes."""
    ks = jax.random.split(key, 8)
    scale = 1.0 / jnp.sqrt(hidden)
    u = lambda k, shape: jax.random.uniform(k, shape, jnp.float32, -scale, scale)

    # PyTorch: weight_ih_l0 (3H, E), weight_hh_l0 (3H, H), gate order (r, z, n).
    w_ih = u(ks[0], (3 * hidden, embed))
    w_hh = u(ks[1], (3 * hidden, hidden))
    b_ih = u(ks[2], (3 * hidden,))
    b_hh = u(ks[3], (3 * hidden,))
    w_out = u(ks[4], (vocab, hidden))          # nn.Linear(H, V).weight
    b_out = u(ks[5], (vocab,))
    emb_tbl = jax.random.normal(ks[6], (vocab, embed), jnp.float32)

    wih = w_ih.reshape(3, hidden, embed)       # (3, H, E), gates r, z, n
    whh = w_hh.reshape(3, hidden, hidden)
    bih = b_ih.reshape(3, hidden)
    bhh = b_hh.reshape(3, hidden)

    hi = jax.lax.Precision.HIGHEST
    # Fold the embedding table into the input-side gate weights: (V, H) each.
    ex_r = jnp.dot(emb_tbl, wih[0].T, precision=hi)
    ex_z = jnp.dot(emb_tbl, wih[1].T, precision=hi)
    ex_n = jnp.dot(emb_tbl, wih[2].T, precision=hi)

    zeros_vh = jnp.zeros((vocab, hidden), jnp.float32)
    zeros_hh = jnp.zeros((hidden, hidden), jnp.float32)

    # Column layout: [ r | z | gi_n | gh_n ]  (N = 4H, lane-dense at H=32).
    wx = jnp.concatenate([ex_r, ex_z, ex_n, zeros_vh], axis=1)        # (V, 4H)
    wh = jnp.concatenate([whh[0].T, whh[1].T, zeros_hh, whh[2].T],
                         axis=1)                                      # (H, 4H)
    bgate = jnp.concatenate(
        [bih[0] + bhh[0], bih[1] + bhh[1], bih[2], bhh[2]]
    ).reshape(1, 4 * hidden)

    # Lane-pad the readout so the logits store is unmasked.
    vpad = ((vocab + 127) // 128) * 128
    wout_pad = jnp.zeros((hidden, vpad), jnp.float32).at[:, :vocab].set(w_out.T)
    bout_pad = jnp.zeros((1, vpad), jnp.float32).at[:, :vocab].set(b_out)

    return {
        "embed": emb_tbl,
        "wx": wx,
        "wh": wh,
        "bgate": bgate,
        "wout_pad": wout_pad,
        "bout_pad": bout_pad,
        "_raw": (w_ih, w_hh, b_ih, b_hh, w_out, b_out),
    }


def _reference(params, tokens, hidden):
    """Pure-JAX reference of the PyTorch forward (correctness check)."""
    w_ih, w_hh, b_ih, b_hh, w_out, b_out = params["_raw"]
    H = w_hh.shape[1]
    hi = jax.lax.Precision.HIGHEST
    x = jnp.take(params["embed"], tokens, axis=0)
    h = hidden[0]
    gi = jnp.dot(x, w_ih.T, precision=hi) + b_ih
    gh = jnp.dot(h, w_hh.T, precision=hi) + b_hh
    r = jax.nn.sigmoid(gi[:, :H] + gh[:, :H])
    z = jax.nn.sigmoid(gi[:, H:2 * H] + gh[:, H:2 * H])
    n = jnp.tanh(gi[:, 2 * H:] + r * gh[:, 2 * H:])
    h_new = (1.0 - z) * n + z * h
    logits = jnp.dot(h_new, w_out.T, precision=hi) + b_out
    return logits, h_new[None]


if __name__ == "__main__":
    VOCAB, EMBED, HIDDEN, BATCH = 64, 32, 32, 8

    key = jax.random.PRNGKey(0)
    k_param, k_tok, k_hid = jax.random.split(key, 3)

    params = init_params(k_param, VOCAB, EMBED, HIDDEN)
    input_token = jax.random.randint(k_tok, (BATCH,), 0, VOCAB, dtype=jnp.int32)
    hidden_state = jax.random.normal(k_hid, (1, BATCH, HIDDEN), jnp.float32)

    logits, next_hidden = jax.jit(decoder_step)(params, input_token, hidden_state)
    jax.block_until_ready((logits, next_hidden))

    ref_logits, ref_hidden = _reference(params, input_token, hidden_state)
    assert logits.shape == (BATCH, VOCAB) and next_hidden.shape == (1, BATCH, HIDDEN)
    assert jnp.allclose(logits, ref_logits, atol=1e-4), \
        float(jnp.max(jnp.abs(logits - ref_logits)))
    assert jnp.allclose(next_hidden, ref_hidden, atol=1e-4), \
        float(jnp.max(jnp.abs(next_hidden - ref_hidden)))

    print("KERNEL_OK")
</pallas_src>

<mosaic_0001>
module attributes {stable_mosaic.version = 11 : i64} {
  func.func @gru_decoder_kernel(%arg0: memref<8x1xi32, #tpu.memory_space<vmem>>, %arg1: memref<8x32xf32, #tpu.memory_space<vmem>>, %arg2: memref<64x128xf32, #tpu.memory_space<vmem>>, %arg3: memref<32x128xf32, #tpu.memory_space<vmem>>, %arg4: memref<1x128xf32, #tpu.memory_space<vmem>>, %arg5: memref<32x128xf32, #tpu.memory_space<vmem>>, %arg6: memref<1x128xf32, #tpu.memory_space<vmem>>, %arg7: memref<8x128xf32, #tpu.memory_space<vmem>>, %arg8: memref<8x32xf32, #tpu.memory_space<vmem>>) attributes {dimension_semantics = [], scalar_prefetch = 0 : i64, scratch_operands = 0 : i64, tpu.core_type = #tpu.core_type<tc>} {
    %c0 = arith.constant 0 : index
    %c0_0 = arith.constant 0 : index
    %0 = vector.load %arg0[%c0, %c0_0] : memref<8x1xi32, #tpu.memory_space<vmem>>, vector<8x1xi32>
    %1 = tpu.iota {dimensions = array<i32: 1>} : vector<8x64xi32>
    %2 = vector.broadcast %0 : vector<8x1xi32> to vector<8x64xi32>
    %3 = arith.cmpi eq, %1, %2 : vector<8x64xi32>
    %cst = arith.constant 1.000000e+00 : f32
    %cst_1 = arith.constant 0.000000e+00 : f32
    %4 = vector.broadcast %cst : f32 to vector<8x64xf32>
    %5 = vector.broadcast %cst_1 : f32 to vector<8x64xf32>
    %6 = arith.select %3, %4, %5 : vector<8x64xi1>, vector<8x64xf32>
    %c0_2 = arith.constant 0 : index
    %c0_3 = arith.constant 0 : index
    %7 = vector.load %arg1[%c0_2, %c0_3] : memref<8x32xf32, #tpu.memory_space<vmem>>, vector<8x32xf32>
    %c0_4 = arith.constant 0 : index
    %c0_5 = arith.constant 0 : index
    %8 = vector.load %arg2[%c0_4, %c0_5] : memref<64x128xf32, #tpu.memory_space<vmem>>, vector<64x128xf32>
    %cst_6 = arith.constant dense<0.000000e+00> : vector<8x128xf32>
    %9 = tpu.matmul %6, %8, %cst_6 {dimension_numbers = #tpu.dot_dimension_numbers<[1], [0], [0], [1], [0, 0, 1, 1], [], []>} : vector<8x64xf32>, vector<64x128xf32>, vector<8x128xf32> -> vector<8x128xf32>
    %c0_7 = arith.constant 0 : index
    %c0_8 = arith.constant 0 : index
    %10 = vector.load %arg3[%c0_7, %c0_8] : memref<32x128xf32, #tpu.memory_space<vmem>>, vector<32x128xf32>
    %cst_9 = arith.constant dense<0.000000e+00> : vector<8x128xf32>
    %11 = tpu.matmul %7, %10, %cst_9 {dimension_numbers = #tpu.dot_dimension_numbers<[1], [0], [0], [1], [0, 0, 1, 1], [], []>} : vector<8x32xf32>, vector<32x128xf32>, vector<8x128xf32> -> vector<8x128xf32>
    %12 = arith.addf %9, %11 : vector<8x128xf32>
    %c0_10 = arith.constant 0 : index
    %c0_11 = arith.constant 0 : index
    %13 = vector.load %arg4[%c0_10, %c0_11] : memref<1x128xf32, #tpu.memory_space<vmem>>, vector<1x128xf32>
    %14 = vector.broadcast %13 : vector<1x128xf32> to vector<8x128xf32>
    %15 = arith.addf %12, %14 : vector<8x128xf32>
    %16 = vector.extract_strided_slice %15 {offsets = [0, 0], sizes = [8, 32], strides = [1, 1]} : vector<8x128xf32> to vector<8x32xf32>
    %17 = arith.negf %16 : vector<8x32xf32>
    %18 = math.exp %17 : vector<8x32xf32>
    %cst_12 = arith.constant 1.000000e+00 : f32
    %19 = vector.broadcast %cst_12 : f32 to vector<8x32xf32>
    %20 = arith.addf %19, %18 : vector<8x32xf32>
    %21 = arith.divf %19, %20 : vector<8x32xf32>
    %22 = vector.extract_strided_slice %15 {offsets = [0, 32], sizes = [8, 32], strides = [1, 1]} : vector<8x128xf32> to vector<8x32xf32>
    %23 = arith.negf %22 : vector<8x32xf32>
    %24 = math.exp %23 : vector<8x32xf32>
    %cst_13 = arith.constant 1.000000e+00 : f32
    %25 = vector.broadcast %cst_13 : f32 to vector<8x32xf32>
    %26 = arith.addf %25, %24 : vector<8x32xf32>
    %27 = arith.divf %25, %26 : vector<8x32xf32>
    %28 = vector.extract_strided_slice %15 {offsets = [0, 64], sizes = [8, 32], strides = [1, 1]} : vector<8x128xf32> to vector<8x32xf32>
    %29 = vector.extract_strided_slice %15 {offsets = [0, 96], sizes = [8, 32], strides = [1, 1]} : vector<8x128xf32> to vector<8x32xf32>
    %30 = arith.mulf %21, %29 : vector<8x32xf32>
    %31 = arith.addf %28, %30 : vector<8x32xf32>
    %32 = math.tanh %31 : vector<8x32xf32>
    %cst_14 = arith.constant 1.000000e+00 : f32
    %33 = vector.broadcast %cst_14 : f32 to vector<8x32xf32>
    %34 = arith.subf %33, %27 : vector<8x32xf32>
    %35 = arith.mulf %34, %32 : vector<8x32xf32>
    %36 = arith.mulf %27, %7 : vector<8x32xf32>
    %37 = arith.addf %35, %36 : vector<8x32xf32>
    %c0_15 = arith.constant 0 : index
    %c0_16 = arith.constant 0 : index
    %38 = vector.load %arg8[%c0_15, %c0_16] : memref<8x32xf32, #tpu.memory_space<vmem>>, vector<8x32xf32>
    tpu.vector_store %arg8[%c0_15, %c0_16], %37 {strides = array<i32>} : memref<8x32xf32, #tpu.memory_space<vmem>>, vector<8x32xf32>,
    %c0_17 = arith.constant 0 : index
    %c0_18 = arith.constant 0 : index
    %39 = vector.load %arg5[%c0_17, %c0_18] : memref<32x128xf32, #tpu.memory_space<vmem>>, vector<32x128xf32>
    %cst_19 = arith.constant dense<0.000000e+00> : vector<8x128xf32>
    %40 = tpu.matmul %37, %39, %cst_19 {dimension_numbers = #tpu.dot_dimension_numbers<[1], [0], [0], [1], [0, 0, 1, 1], [], []>} : vector<8x32xf32>, vector<32x128xf32>, vector<8x128xf32> -> vector<8x128xf32>
    %c0_20 = arith.constant 0 : index
    %c0_21 = arith.constant 0 : index
    %41 = vector.load %arg6[%c0_20, %c0_21] : memref<1x128xf32, #tpu.memory_space<vmem>>, vector<1x128xf32>
    %42 = vector.broadcast %41 : vector<1x128xf32> to vector<8x128xf32>
    %43 = arith.addf %40, %42 : vector<8x128xf32>
    %c0_22 = arith.constant 0 : index
    %c0_23 = arith.constant 0 : index
    %44 = vector.load %arg7[%c0_22, %c0_23] : memref<8x128xf32, #tpu.memory_space<vmem>>, vector<8x128xf32>
    tpu.vector_store %arg7[%c0_22, %c0_23], %43 {strides = array<i32>} : memref<8x128xf32, #tpu.memory_space<vmem>>, vector<8x128xf32>,
    return
  }
}

</mosaic_0001>

<bundles_post_ra>
// kernel: decoder_step.1
= control target key start
LH: loop header
LB: loop body
LE: loop exit
PB: predicated region body
PF: predicated region fallthrough
CT: control target
= control target key end

     0   :  { %14 = vsyncpa [#allocation3], 0  ;;  %s686_s0 = inlined_call_operand.vmem [shape: s32[8,1], index: 0, kind: input, shape index: {}]   ;;  %s687_s1 = inlined_call_operand.vmem [shape: f32[8,32], index: 1, kind: input, shape index: {}, may-alias: {1,8}]   ;;  %s688_s2 = inlined_call_operand.hbm [shape: f32[64,128], index: 2, kind: input, shape index: {}]   ;;  %s689_s3 = inlined_call_operand.vmem [shape: f32[32,128], index: 3, kind: input, shape index: {}]   ;;  %s690_s4 = inlined_call_operand.vmem [shape: f32[1,128], index: 4, kind: input, shape index: {}]   ;;  %s691_s5 = inlined_call_operand.hbm [shape: f32[32,128], index: 5, kind: input, shape index: {}]   ;;  %s692_s6 = inlined_call_operand.vmem [shape: f32[1,128], index: 6, kind: input, shape index: {}]   ;;  %s693_s7 = inlined_call_operand.hbm [shape: f32[8,128], index: 7, kind: output, shape index: {0}]   ;;  %s694_s8 = inlined_call_operand.vmem [shape: f32[8,32], index: 8, kind: output, shape index: {1}, may-alias: {1,8}]  }
   0x1   :  { %15 = vsyncpa [#allocation6], 0 }
   0x2   :  { %16 = vsyncpa [#allocation4], 0  ;;  %s552_s27 = smov [#allocation2]   ;;  %s480_s9 = scalar_lea.hbm %s688_s2, 1024 }
   0x3   :  { %s26_s28 = sshll.u32 %s552_s27, 4  ;;  %p481_p0 = scmp.ne.s32.totalorder %s688_s2, %s480_s9  ;;  %s27_s28 = int_to_ptr.vmem [resolvable:$true] %s26_s28 }
   0x4   :  { %p484_p1 = scmp.lt.u32.totalorder %s480_s9, %s688_s2 }
   0x6   :  { %p486_p2 = pnand %p484_p1, %p481_p0 }
   0x8   :  { %489 = shalt.err (!%p486_p2)
}
   0x9   :  { %s490_s14 = scalar_lea.vmem %s27_s28, 1024  ;;  %p495_p4 = scmp.lt.s32.totalorder %s27_s28, %s27_s28 }
   0xa   :  { %p491_p3 = scmp.ne.s32.totalorder %s27_s28, %s490_s14  ;;  %p496_p5 = scmp.lt.s32.totalorder %s490_s14, %s490_s14 }
   0xc   :  { %p497_p6 = por %p496_p5, %p495_p4 }
   0xe   :  { %p498_p7 = pnand %p497_p6, %p491_p3 }
  0x10   :  { %501 = shalt.err (!%p498_p7)
}
  0x11   :  { %s553_s15 = smov 128   ;;  %s554_s16 = smov 8  }
  0x12   :  { %32 = dma.hbm_to_vmem [thread:$0]  %s688_s2, 1024, %s27_s28, [#allocation3], %s553_s15, %s553_s15, %s554_s16  }
  0x13   :  { %s555_s19 = smov [#allocation5]   ;;  %s502_s23 = scalar_lea.hbm %s691_s5, 512 }
  0x14   :  { %s42_s20 = sshll.u32 %s555_s19, 4  ;;  %p503_p8 = scmp.ne.s32.totalorder %s691_s5, %s502_s23  ;;  %s43_s20 = int_to_ptr.vmem [resolvable:$true] %s42_s20 }
  0x15   :  { %p506_p9 = scmp.lt.u32.totalorder %s502_s23, %s691_s5 }
  0x17   :  { %p508_p10 = pnand %p506_p9, %p503_p8 }
  0x19   :  { %511 = shalt.err (!%p508_p10)
}
  0x1a   :  { %s512_s29 = scalar_lea.vmem %s43_s20, 512  ;;  %p517_p12 = scmp.lt.s32.totalorder %s43_s20, %s43_s20 }
  0x1b   :  { %p513_p11 = scmp.ne.s32.totalorder %s43_s20, %s512_s29  ;;  %p518_p13 = scmp.lt.s32.totalorder %s512_s29, %s512_s29 }
  0x1d   :  { %p519_p0 = por %p518_p13, %p517_p12 }
  0x1f   :  { %p520_p1 = pnand %p519_p0, %p513_p11 }
  0x21   :  { %523 = shalt.err (!%p520_p1)
}
  0x22   :  { %48 = dma.hbm_to_vmem [thread:$0]  %s691_s5, 512, %s43_s20, [#allocation6], %s553_s15, %s553_s15, %s554_s16  }
  0x23   :  { %546 = dma.done.wait [#allocation3], 1024  }
  0x24   :  { %547 = vsyncadd [#allocation3], 4294966272 }
  0x25   :  { %548 = dma.done.wait [#allocation6], 512  }
  0x26   :  { %549 = vsyncadd [#allocation6], 4294966784  ;;  %v556_v0 = vmov 0   ;;  %v557_v1 = vmov 0.0|0.0   ;;  %v57_v2 = vld [vmem:[%s686_s0] sm:$0xff]  ;;  %v67_v4 = vld [vmem:[#allocation2 + $0x8] sm:$0xff]  ;;  %v58_v23 = vlaneseq }
  0x27   :  { %473 = vset.pattern.permute.xlu0 %v556_v0  ;;  %443 = vmatprep.subr.bf16.mxu1 %v557_v1  ;;  %v66_v3 = vld [vmem:[#allocation2] sm:$0xff]  ;;  %v68_v6 = vld [vmem:[#allocation2 + $0x10] sm:$0xff]  ;;  %v69_v7 = vld [vmem:[#allocation2 + $0x18] sm:$0xff]  ;;  %vm558_vm0 = vmmov 0   ;;  %v559_v9 = vmov 0.0   ;;  %vm78_vm1 = vcmask 261120  }
  0x28   :  { %437 = vmatprep.subr.bf16.mxu0 %v557_v1  ;;  %61 = vperm.xlu0 %473, %v57_v2   ;;  %v444_v5 = vpack.c.bf16 %v67_v4, %v66_v3  ;;  %v74_v8 = vld [vmem:[%s689_s3] sm:$0xff]  ;;  %v75_v10 = vld [vmem:[%s689_s3 + $0x8] sm:$0xff]  ;;  %v447_v11 = vpack.c.bf16 %v69_v7, %v68_v6  ;;  %v76_v13 = vld [vmem:[%s689_s3 + $0x10] sm:$0xff]  ;;  %v59_v24 = vand.u32 127, %v58_v23  ;;  %vm152_vm2 = vcmask 523264   ;;  %s560_s18 = smov 32  }
  0x29   :  { %404 = vmatprep.mubr.msk.f32.mxu0 %vm558_vm0, %v559_v9  ;;  %423 = vmatprep.mubr.msk.f32.mxu1 %vm558_vm0, %v559_v9  ;;  %v438_v12 = vpack.c.bf16 %v75_v10, %v74_v8  ;;  %v77_v14 = vld [vmem:[%s689_s3 + $0x18] sm:$0xff]  ;;  %v70_v15 = vld [vmem:[#allocation2 + $0x20] sm:$0xff]  ;;  %v71_v16 = vld [vmem:[#allocation2 + $0x28] sm:$0xff]  ;;  %s561_s19 = smov 64   ;;  %s563_s24 = smov [#allocation7]  }
  0x2a   :  { %445 = vmatpush3.bf16.msra.mxu1 %v444_v5  ;;  %v441_v17 = vpack.c.bf16 %v77_v14, %v76_v13  ;;  %v450_v18 = vpack.c.bf16 %v71_v16, %v70_v15  ;;  %v72_v19 = vld [vmem:[#allocation2 + $0x30] sm:$0xff]  ;;  %v73_v20 = vld [vmem:[#allocation2 + $0x38] sm:$0xff]  ;;  %v65_v21 = vld [vmem:[%s687_s1] sm:$0xff]  ;;  %s357_s25 = sshll.u32 %s563_s24, 4  ;;  %s358_s25 = int_to_ptr.vmem [resolvable:$true] %s357_s25 }
  0x2b   :  { %446 = vmatprep.subr.bf16.mxu1 %v557_v1  ;;  %439 = vmatpush3.bf16.msra.mxu0 %v438_v12  ;;  %v453_v22 = vpack.c.bf16 %v73_v20, %v72_v19  ;;  %v373_v30 = vld [vmem:[%s690_s4] ss:$0 sm:$0xff]  ;;  %v268_v43 = vld [vmem:[#allocation5 + $0x8] sm:$0xff]  ;;  %v269_v44 = vld [vmem:[#allocation5 + $0x10] sm:$0xff]  ;;  %s562_s4 = smov 96   ;;  %s524_s26 = scalar_lea.vmem %s358_s25, 128 }
  0x2c   :  { %440 = vmatprep.subr.bf16.mxu0 %v557_v1  ;;  %v267_v42 = vld [vmem:[#allocation5] sm:$0xff]  ;;  %v270_v46 = vld [vmem:[#allocation5 + $0x18] sm:$0xff]  ;;  %p525_p2 = scmp.ne.s32.totalorder %s358_s25, %s524_s26  ;;  %p529_p3 = scmp.lt.s32.totalorder %s358_s25, %s358_s25 }
  0x2d   :  { %v456_v45 = vpack.c.bf16 %v268_v43, %v267_v42  ;;  %v459_v47 = vpack.c.bf16 %v270_v46, %v269_v44  ;;  %v375_v56 = vld [vmem:[%s692_s6] ss:$0 sm:$0xff]  ;;  %p530_p4 = scmp.lt.s32.totalorder %s524_s26, %s524_s26 }
  0x2e   :  { %448 = vmatpush3.bf16.msra.mxu1 %v447_v11 }
  0x2f   :  { %449 = vmatprep.subr.bf16.mxu1 %v557_v1  ;;  %442 = vmatpush3.bf16.msra.mxu0 %v441_v17  ;;  %p531_p5 = por %p530_p4, %p529_p3 }
  0x30   :  { %455 = vmatprep.subr.bf16.mxu0 %v557_v1 }
  0x31   :  { %p532_p6 = pnand %p531_p5, %p525_p2 }
  0x32   :  { %451 = vmatpush3.bf16.msra.mxu1 %v450_v18  ;;  %405 = vmatmul.mubr.msk.f32.vlgmr.msra.gmra.mrb[0].mxu0 %vm78_vm1, %v65_v21 }
  0x33   :  { %452 = vmatprep.subr.bf16.mxu1 %v557_v1  ;;  %434 = vmatprep.mubr.msk.f32.mxu0 %vm558_vm0, %v559_v9 }
  0x34   :  { %457 = vmatpush3.bf16.msra.mxu0 %v456_v45 }
  0x35   :  { %458 = vmatprep.subr.bf16.mxu0 %v557_v1 }
  0x36   :  { %454 = vmatpush3.bf16.msra.mxu1 %v453_v22 }
  0x38   :  { %460 = vmatpush3.bf16.msra.mxu0 %v459_v47 }
  0xa7   :  { %v62_v25 = vpop.permute.xlu0 %61 }
  0xa8   :  { %vm63_vm3 = vcmp.eq.s32.totalorder %v59_v24, %v62_v25 }
  0xa9   :  { %v64_v26 = vsel %vm63_vm3, 1.0, %v559_v9 }
  0xaa   :  { %424 = vmatmul.mubr.msk.f32.vlgmr.msra.gmra.mrb[0].mxu1 %vm152_vm2, %v64_v26 }
 0x105   :  { %v148_v27 = vpop.f32.mrb[0].mxu0 }
 0x106   :  { %v406_v28 = vpop.f32.mrb[1].mxu0 }
 0x17d   :  { %v222_v29 = vpop.f32.mrb[0].mxu1 }
 0x17e   :  { %v223_v31 = vadd.f32 %v222_v29, %v148_v27  ;;  %v425_v32 = vpop.f32.mrb[1].mxu1 }
 0x180   :  { %v233_v33 = vadd.f32 %v373_v30, %v223_v31 }
 0x182   :  { %241 = vrot.lane.b32.xlu0 %v233_v33, %s560_s18  ;;  %v374_v34 = vmul.f32 -1.442695, %v233_v33 }
 0x184   :  { %474 = vpow2.f32 %v374_v34 }
 0x186   :  { %257 = vrot.lane.b32.xlu0 %v65_v21, %s560_s18 }
 0x18e   :  { %v475_v35 = vpop.eup %474 }
 0x18f   :  { %v237_v36 = vadd.f32 1.0, %v475_v35 }
 0x191   :  { %476 = vrcp.f32 %v237_v36 }
 0x19b   :  { %v477_v37 = vpop.eup %476 }
 0x19c   :  { %v251_v50 = vsub.f32 1.0, %v477_v37 }
 0x1f4   :  { %v242_v38 = vpop.permute.xlu0 %241 }
 0x1f5   :  { %v244_v39 = vmul.f32 %v477_v37, %v242_v38 }
 0x1f7   :  { %246 = vrot.lane.b32.xlu1 %v244_v39, %s561_s19 }
 0x1f8   :  { %v258_v49 = vpop.permute.xlu0 %257 }
 0x1f9   :  { %v260_v52 = vmul.f32 %v477_v37, %v258_v49 }
 0x269   :  { %v247_v40 = vpop.permute.xlu1 %246 }
 0x26a   :  { %v249_v41 = vadd.f32 %v247_v40, %v233_v33 }
 0x26c   :  { %478 = vtanh.f32 %v249_v41 }
 0x276   :  { %v479_v48 = vpop.eup %478 }
 0x277   :  { %253 = vrot.lane.b32.xlu1 %v479_v48, %s562_s4 }
 0x2e9   :  { %v254_v51 = vpop.permute.xlu1 %253 }
 0x2ea   :  { %v256_v53 = vmul.f32 %v254_v51, %v251_v50 }
 0x2ec   :  { %v261_v54 = vadd.f32 %v260_v52, %v256_v53 }
 0x2ee   :  { %263 = vrot.lane.b32.xlu1 %v261_v54, %s562_s4 }
 0x360   :  { %v264_v55 = vpop.permute.xlu1 %263 }
 0x361   :  { %266 = vst.msk [vmem:[%s694_s8] sm:$0xff] %vm78_vm1, %v264_v55  ;;  %435 = vmatmul.mubr.msk.f32.vlgmr.msra.gmra.mrb[2].mxu0 %vm78_vm1, %v264_v55 }
 0x434   :  { %v346_v57 = vpop.f32.mrb[2].mxu0 }
 0x435   :  { %v347_v58 = vadd.f32 %v375_v56, %v346_v57  ;;  %v436_v59 = vpop.f32.mrb[3].mxu0 }
 0x437   :  { %350 = vst [vmem:[#allocation7] sm:$0xff] %v347_v58 }
 0x438   :  { %535 = shalt.err (!%p532_p6)
}
 0x439   :  { %s536_s29 = scalar_lea.hbm %s693_s7, 128 }
 0x43a   :  { %p537_p7 = scmp.ne.s32.totalorder %s693_s7, %s536_s29  ;;  %p540_p8 = scmp.lt.u32.totalorder %s536_s29, %s693_s7 }
 0x43c   :  { %p542_p9 = pnand %p540_p8, %p537_p7 }
 0x43e   :  { %545 = shalt.err (!%p542_p9)
}
 0x43f   :  { %360 = dma.vmem_to_hbm [thread:$0]  %s358_s25, 128, %s693_s7, [#allocation4]  }
 0x440   :  { %550 = dma.done.wait [#allocation4], 128  }
 0x441   :  { %551 = vsyncadd [#allocation4], 4294967168 }
 0x442   :  { %368 = vsyncpa [#allocation3], 1 }
 0x443   :  { %369 = vsyncpa [#allocation6], 1 }
 0x444   :  { %370 = vsyncpa [#allocation4], 1 }

</bundles_post_ra>
